<compile_context>
chip_gen: v7x
topology: tpu7x:2x2x1
jax: 0.10.0
libtpu: 0.0.40
codegen_flags: <defaults>
</compile_context>

<pallas_src>
import numpy as np
import jax
import jax.numpy as jnp
from jax.experimental import pallas as pl
from jax.experimental.pallas import tpu as pltpu


# ----------------------------- schedule glue --------------------------------
def make_beta_schedule_linear(n_timestep, linear_start=1e-4, linear_end=2e-2):
    # matches make_beta_schedule(schedule='linear', ...)
    return np.linspace(linear_start, linear_end, n_timestep, dtype=np.float64)


def sample_rayleigh_log(key, shape, scale=1.0):
    # matches sample_rayleigh_log() from the PyTorch module
    u = jax.random.uniform(key, shape, dtype=jnp.float32)
    u = jnp.clip(u, 1e-6, 1.0 - 1e-6)
    m = scale * jnp.sqrt(-2.0 * jnp.log(u) + 1e-8)
    m = jnp.clip(m, 1e-8, 1e6)
    return jnp.log(m + 1e-8)


# ------------------------------ Pallas kernel --------------------------------
def _p_losses_kernel(c_ref, sr_ref, hr_ref, noise_ref,
                     w1_ref, b1_ref, wn_ref, w2_ref, b2_ref,
                     loss_ref):
    """One lane-dense slab; lane axis = B*H*W (batch folded into lanes).

    c_ref     : (1, L)   per-lane continuous sqrt(alpha_cumprod) (c[b] repeated HW times)
    sr_ref    : (C, L)   conditioning (SR) image
    hr_ref    : (C, L)   target (HR) image
    noise_ref : (C, L)   UNclipped log-Rayleigh noise (loss target)
    w1_ref    : (Hd, 2C) fused first-layer 1x1-conv weight (acts on [SR ; x_noisy])
    b1_ref    : (Hd, 1)  first-layer bias
    wn_ref    : (Hd, 1)  noise-level conditioning projection
    w2_ref    : (C, Hd)  second-layer 1x1-conv weight
    b2_ref    : (C, 1)   second-layer bias
    loss_ref  : (1, 1)   SMEM scalar output (L1-sum loss)
    """
    c = c_ref[...]                                     # (1, L)
    lognoise = noise_ref[...]                          # (C, L)

    # q_sample (multiplicative log-Rayleigh): x_noisy = c * HR * exp(clip(noise))
    e = jnp.exp(jnp.clip(lognoise, -20.0, 20.0))       # (C, L)  -- EUP
    x_noisy = c * hr_ref[...] * e                      # (C, L)

    # torch.cat([SR, x_noisy], dim=1): sublane concat of two (C, L) half-tiles.
    cat = jnp.concatenate([sr_ref[...], x_noisy], axis=0)          # (2C, L)

    # denoise_fn(cat, noise_level=c): 1x1 conv -> ReLU -> 1x1 conv with
    # noise-level conditioning.
    # TODO(synk): real SR3 denoise_fn is an external UNet; this synthetic
    # 2-layer conditional 1x1-conv denoiser stands in for it here.
    bias1 = b1_ref[...] + wn_ref[...] * c                           # (Hd, L)
    h = jnp.dot(w1_ref[...], cat,
                preferred_element_type=jnp.float32) + bias1         # (Hd, L)
    h = jnp.maximum(h, 0.0)
    x_recon = jnp.dot(w2_ref[...], h,
                      preferred_element_type=jnp.float32) + b2_ref[...]   # (C, L)

    # L1Loss(reduction='sum') against the UNclipped noise (matches the torch
    # module: only q_sample clips the noise, not the loss target).
    loss_ref[0, 0] = jnp.sum(jnp.abs(x_recon - lognoise))


def gaussian_diffusion_loss(sr, hr, c, noise, params):
    """sr/hr/noise: (B, C, HW) f32 (NCHW with spatial flattened); c: (B, 1) f32.
    Returns scalar L1-sum loss.  Wrapper does only layout plumbing: fold the
    batch into the lane axis ((B, C, HW) -> (C, B*HW))."""
    B, C, HW = hr.shape
    L = B * HW
    Hd = params["w1"].shape[0]

    def to_lanes(x):                                   # (B, C, HW) -> (C, B*HW)
        return jnp.transpose(x, (1, 0, 2)).reshape(C, L)

    sr_l = to_lanes(sr)
    hr_l = to_lanes(hr)
    noise_l = to_lanes(noise)
    c_lane = jnp.broadcast_to(c.reshape(B, 1), (B, HW)).reshape(1, L)

    flops = 2 * Hd * L * (2 * C + C) + 8 * C * L       # two dots + elementwise
    transcendentals = C * L                            # exp
    bytes_accessed = 4 * (L + 3 * C * L + 2 * C * Hd + 2 * Hd + C * Hd + C + 1)

    vmem = pl.BlockSpec(memory_space=pltpu.MemorySpace.VMEM)

    # NOTE: grid=() on purpose -- latency-bound at these sizes.  When B*HW
    # scales up, switch to an HW-tiled grid marked "parallel" (megacore on
    # v7x) with a loss accumulator and an explicit vmem_limit_bytes.
    loss = pl.pallas_call(
        _p_losses_kernel,
        out_shape=jax.ShapeDtypeStruct((1, 1), jnp.float32),
        in_specs=[vmem] * 9,
        out_specs=pl.BlockSpec(memory_space=pltpu.MemorySpace.SMEM),
        cost_estimate=pl.CostEstimate(flops=int(flops),
                                      transcendentals=int(transcendentals),
                                      bytes_accessed=int(bytes_accessed)),
    )(c_lane, sr_l, hr_l, noise_l,
      params["w1"], params["b1"], params["wn"], params["w2"], params["b2"])
    return loss[0, 0]


# ----------------------------- pure-JAX reference ----------------------------
def reference_loss(sr, hr, c, noise, params):
    # sr/hr/noise: (B, C, HW); c: (B, 1)
    noise_cl = jnp.clip(noise, -20.0, 20.0)
    x_noisy = c[:, :, None] * hr * jnp.exp(noise_cl)
    cat = jnp.concatenate([sr, x_noisy], axis=1)                      # (B, 2C, HW)
    h = (jnp.einsum('hk,bkw->bhw', params["w1"], cat)
         + params["b1"][None] + c[:, :, None] * params["wn"][None])
    h = jnp.maximum(h, 0.0)
    x_recon = jnp.einsum('ck,bkw->bcw', params["w2"], h) + params["b2"][None]
    return jnp.sum(jnp.abs(x_recon - noise))


# ----------------------------------- main ------------------------------------
if __name__ == "__main__":
    key = jax.random.PRNGKey(0)
    B, C, H, W = 2, 4, 16, 16        # batch, channels, spatial
    HW = H * W                       # 256; kernel lane axis is B*HW = 512
    Hd = 32                          # hidden width of synthetic denoise_fn

    # set_new_noise_schedule equivalent ('linear', 100 steps)
    n_timestep = 100
    betas = make_beta_schedule_linear(n_timestep)
    alphas_cumprod = np.cumprod(1.0 - betas)
    sqrt_alphas_cumprod_prev = np.sqrt(np.append(1.0, alphas_cumprod)).astype(np.float32)

    (k_hr, k_sr, k_t, k_c, k_noise,
     k_w1, k_b1, k_wn, k_w2, k_b2) = jax.random.split(key, 10)

    # inputs are NCHW like the torch module; wrapper flattens H*W and folds B into lanes
    hr_nchw = jax.random.normal(k_hr, (B, C, H, W), jnp.float32)
    sr_nchw = jax.random.normal(k_sr, (B, C, H, W), jnp.float32)
    hr = hr_nchw.reshape(B, C, HW)
    sr = sr_nchw.reshape(B, C, HW)

    # t ~ randint(1, T+1); c ~ U(sqrt_ac_prev[t-1], sqrt_ac_prev[t]) per batch elem
    t = int(jax.random.randint(k_t, (), 1, n_timestep + 1))
    lo = float(sqrt_alphas_cumprod_prev[t - 1])
    hi = float(sqrt_alphas_cumprod_prev[t])
    c = jax.random.uniform(k_c, (B, 1), jnp.float32, minval=lo, maxval=hi)

    noise = sample_rayleigh_log(k_noise, (B, C, HW))

    # deterministic synthetic denoise_fn parameters (fused first-layer weight)
    s = 0.1
    params = {
        "w1": s * jax.random.normal(k_w1, (Hd, 2 * C), jnp.float32),   # acts on [SR ; x_noisy]
        "b1": s * jax.random.normal(k_b1, (Hd, 1), jnp.float32),
        "wn": s * jax.random.normal(k_wn, (Hd, 1), jnp.float32),       # noise-level projection
        "w2": s * jax.random.normal(k_w2, (C, Hd), jnp.float32),
        "b2": s * jax.random.normal(k_b2, (C, 1), jnp.float32),
    }

    loss = jax.block_until_ready(gaussian_diffusion_loss(sr, hr, c, noise, params))
    ref = jax.block_until_ready(reference_loss(sr, hr, c, noise, params))
    np.testing.assert_allclose(np.asarray(loss), np.asarray(ref), rtol=1e-4, atol=1e-4)

    print("KERNEL_OK")
</pallas_src>

<mosaic_0001>
module attributes {stable_mosaic.version = 11 : i64} {
  func.func @_p_losses_kernel(%arg0: memref<1x512xf32, #tpu.memory_space<vmem>>, %arg1: memref<4x512xf32, #tpu.memory_space<vmem>>, %arg2: memref<4x512xf32, #tpu.memory_space<vmem>>, %arg3: memref<4x512xf32, #tpu.memory_space<vmem>>, %arg4: memref<32x8xf32, #tpu.memory_space<vmem>>, %arg5: memref<32x1xf32, #tpu.memory_space<vmem>>, %arg6: memref<32x1xf32, #tpu.memory_space<vmem>>, %arg7: memref<4x32xf32, #tpu.memory_space<vmem>>, %arg8: memref<4x1xf32, #tpu.memory_space<vmem>>, %arg9: memref<1x1xf32, #tpu.memory_space<smem>>) attributes {dimension_semantics = [], scalar_prefetch = 0 : i64, scratch_operands = 0 : i64, tpu.core_type = #tpu.core_type<tc>} {
    %c0 = arith.constant 0 : index
    %c0_0 = arith.constant 0 : index
    %0 = vector.load %arg0[%c0, %c0_0] : memref<1x512xf32, #tpu.memory_space<vmem>>, vector<1x512xf32>
    %c0_1 = arith.constant 0 : index
    %c0_2 = arith.constant 0 : index
    %1 = vector.load %arg3[%c0_1, %c0_2] : memref<4x512xf32, #tpu.memory_space<vmem>>, vector<4x512xf32>
    %cst = arith.constant -2.000000e+01 : f32
    %cst_3 = arith.constant 2.000000e+01 : f32
    %2 = vector.broadcast %cst : f32 to vector<4x512xf32>
    %3 = arith.maximumf %2, %1 : vector<4x512xf32>
    %4 = vector.broadcast %cst_3 : f32 to vector<4x512xf32>
    %5 = arith.minimumf %4, %3 : vector<4x512xf32>
    %6 = math.exp %5 : vector<4x512xf32>
    %c0_4 = arith.constant 0 : index
    %c0_5 = arith.constant 0 : index
    %7 = vector.load %arg2[%c0_4, %c0_5] : memref<4x512xf32, #tpu.memory_space<vmem>>, vector<4x512xf32>
    %8 = vector.broadcast %0 : vector<1x512xf32> to vector<4x512xf32>
    %9 = arith.mulf %8, %7 : vector<4x512xf32>
    %10 = arith.mulf %9, %6 : vector<4x512xf32>
    %c0_6 = arith.constant 0 : index
    %c0_7 = arith.constant 0 : index
    %11 = vector.load %arg1[%c0_6, %c0_7] : memref<4x512xf32, #tpu.memory_space<vmem>>, vector<4x512xf32>
    %12 = tpu.concatenate %11, %10 in 0 : vector<4x512xf32>, vector<4x512xf32> -> vector<8x512xf32>
    %c0_8 = arith.constant 0 : index
    %c0_9 = arith.constant 0 : index
    %13 = vector.load %arg5[%c0_8, %c0_9] : memref<32x1xf32, #tpu.memory_space<vmem>>, vector<32x1xf32>
    %c0_10 = arith.constant 0 : index
    %c0_11 = arith.constant 0 : index
    %14 = vector.load %arg6[%c0_10, %c0_11] : memref<32x1xf32, #tpu.memory_space<vmem>>, vector<32x1xf32>
    %15 = vector.broadcast %14 : vector<32x1xf32> to vector<32x512xf32>
    %16 = vector.broadcast %0 : vector<1x512xf32> to vector<32x512xf32>
    %17 = arith.mulf %15, %16 : vector<32x512xf32>
    %18 = vector.broadcast %13 : vector<32x1xf32> to vector<32x512xf32>
    %19 = arith.addf %18, %17 : vector<32x512xf32>
    %c0_12 = arith.constant 0 : index
    %c0_13 = arith.constant 0 : index
    %20 = vector.load %arg4[%c0_12, %c0_13] : memref<32x8xf32, #tpu.memory_space<vmem>>, vector<32x8xf32>
    %cst_14 = arith.constant dense<0.000000e+00> : vector<32x512xf32>
    %21 = tpu.matmul %20, %12, %cst_14 {dimension_numbers = #tpu.dot_dimension_numbers<[1], [0], [0], [1], [0, 0, 1, 1], [], []>} : vector<32x8xf32>, vector<8x512xf32>, vector<32x512xf32> -> vector<32x512xf32>
    %22 = arith.addf %21, %19 : vector<32x512xf32>
    %cst_15 = arith.constant 0.000000e+00 : f32
    %23 = vector.broadcast %cst_15 : f32 to vector<32x512xf32>
    %24 = arith.maximumf %22, %23 : vector<32x512xf32>
    %c0_16 = arith.constant 0 : index
    %c0_17 = arith.constant 0 : index
    %25 = vector.load %arg7[%c0_16, %c0_17] : memref<4x32xf32, #tpu.memory_space<vmem>>, vector<4x32xf32>
    %cst_18 = arith.constant dense<0.000000e+00> : vector<4x512xf32>
    %26 = tpu.matmul %25, %24, %cst_18 {dimension_numbers = #tpu.dot_dimension_numbers<[1], [0], [0], [1], [0, 0, 1, 1], [], []>} : vector<4x32xf32>, vector<32x512xf32>, vector<4x512xf32> -> vector<4x512xf32>
    %c0_19 = arith.constant 0 : index
    %c0_20 = arith.constant 0 : index
    %27 = vector.load %arg8[%c0_19, %c0_20] : memref<4x1xf32, #tpu.memory_space<vmem>>, vector<4x1xf32>
    %28 = vector.broadcast %27 : vector<4x1xf32> to vector<4x512xf32>
    %29 = arith.addf %26, %28 : vector<4x512xf32>
    %30 = arith.subf %29, %1 : vector<4x512xf32>
    %31 = math.absf %30 : vector<4x512xf32>
    %32 = vector.shape_cast %31 : vector<4x512xf32> to vector<1x4x512xf32>
    %cst_21 = arith.constant dense<0.000000e+00> : vector<1xf32>
    %33 = vector.multi_reduction <add>, %32, %cst_21 [1, 2] : vector<1x4x512xf32> to vector<1xf32>
    %34 = vector.shape_cast %33 : vector<1xf32> to vector<1x1x1xf32>
    %35 = vector.extract %34[0, 0, 0] : f32 from vector<1x1x1xf32>
    %c0_22 = arith.constant 0 : index
    %c0_23 = arith.constant 0 : index
    %36 = memref.load %arg9[%c0_22, %c0_23] : memref<1x1xf32, #tpu.memory_space<smem>>
    memref.store %35, %arg9[%c0_22, %c0_23] : memref<1x1xf32, #tpu.memory_space<smem>>
    return
  }
}

</mosaic_0001>

<bundles_post_ra>
// kernel: tpu_custom_call.1
= control target key start
LH: loop header
LB: loop body
LE: loop exit
PB: predicated region body
PF: predicated region fallthrough
CT: control target
= control target key end

     0   :  { %v47_v1 = vlaneseq  ;;  %v658_v4 = vmov 0.0   ;;  %v659_v7 = vmov 0   ;;  %s852_s0 = inlined_call_operand.vmem [shape: f32[1,512], index: 0, kind: input, shape index: {}]   ;;  %s853_s1 = inlined_call_operand.vmem [shape: f32[4,512], index: 1, kind: input, shape index: {}]   ;;  %s854_s2 = inlined_call_operand.vmem [shape: f32[4,512], index: 2, kind: input, shape index: {}]   ;;  %s855_s3 = inlined_call_operand.vmem [shape: f32[4,512], index: 3, kind: input, shape index: {}]   ;;  %s856_s4 = inlined_call_operand.vmem [shape: f32[32,8], index: 4, kind: input, shape index: {}]   ;;  %s857_s5 = inlined_call_operand.vmem [shape: f32[32,1], index: 5, kind: input, shape index: {}]   ;;  %s858_s6 = inlined_call_operand.vmem [shape: f32[32,1], index: 6, kind: input, shape index: {}]   ;;  %s859_s7 = inlined_call_operand.vmem [shape: f32[4,32], index: 7, kind: input, shape index: {}]   ;;  %s860_s8 = inlined_call_operand.vmem [shape: f32[4,1], index: 8, kind: input, shape index: {}]   ;;  %s861_s9 = inlined_call_operand.hbm [shape: f32[1,1], index: 9, kind: output, shape index: {}]  }
   0x1   :  { %v714_v0 = vld [vmem:[%s855_s3] sm:$0xff]  ;;  %v720_v3 = vld [vmem:[%s855_s3 + $0x8] sm:$0xff]  ;;  %273 = vmatprep.mubr.f32.mxu0 %v658_v4  ;;  %362 = vmatprep.mubr.f32.mxu1 %v658_v4 }
   0x2   :  { %v601_v2 = vclamps-f32 %v714_v0, 20.0  ;;  %v48_v5 = vshrl.u32 %v47_v1, 7  ;;  %v602_v6 = vclamps-f32 %v720_v3, 20.0  ;;  %634 = vset.pattern.permute.xlu0 %v659_v7  ;;  %635 = vset.pattern.permute.xlu1 %v659_v7  ;;  %v116_v9 = vld [vmem:[%s858_s6] sm:$0xff]  ;;  %v117_v14 = vld [vmem:[%s858_s6 + $0x8] sm:$0xff] }
   0x3   :  { %122 = vperm.xlu0 %634, %v116_v9   ;;  %v33_v12 = vld [vmem:[%s852_s0] sm:$0xf]  ;;  %v113_v19 = vld [vmem:[%s857_s5 + $0x8] sm:$0xff] }
   0x4   :  { %v40_v8 = vmul.f32 1.442695, %v601_v2  ;;  %v42_v10 = vmul.f32 1.442695, %v602_v6  ;;  %v49_v11 = vsub.s32 0, %v48_v5  ;;  %v57_v13 = vsub.s32 2, %v48_v5 }
   0x5   :  { %v112_v15 = vld [vmem:[%s857_s5] sm:$0xff]  ;;  %v53_v16 = vsub.s32 1, %v48_v5  ;;  %v61_v18 = vsub.s32 3, %v48_v5 }
   0x6   :  { %642 = vpow2.f32 %v40_v8  ;;  %158 = vperm.xlu1 %635, %v112_v15   ;;  %v44_v17 = vld [vmem:[%s854_s2] sm:$0xff] }
   0x7   :  { %644 = vpow2.f32 %v42_v10 }
   0x8   :  { %14 = vsyncpa [#allocation3], 0  ;;  %v45_v20 = vld [vmem:[%s854_s2 + $0x8] sm:$0xff]  ;;  %v746_v21 = vrot.slane %v33_v12, %v49_v11  ;;  %127 = vperm.xlu0 %634, %v117_v14   ;;  %v748_v22 = vrot.slane %v33_v12, %v57_v13  ;;  %v118_v23 = vld [vmem:[%s858_s6 + $0x10] sm:$0xff]  ;;  %v753_v24 = vrot.slane %v33_v12, %v53_v16  ;;  %v69_v25 = vcombine.high %v44_v17, %v44_v17  ;;  %s646_s0 = scalar_lea.hbm %s861_s9, 16 }
   0x9   :  { %v755_v26 = vrot.slane %v33_v12, %v61_v18  ;;  %v70_v27 = vcombine.high %v45_v20, %v45_v20  ;;  %v119_v28 = vld [vmem:[%s858_s6 + $0x18] sm:$0xff]  ;;  %v114_v31 = vld [vmem:[%s857_s5 + $0x10] sm:$0xff]  ;;  %v87_v34 = vld [vmem:[%s853_s1] sm:$0xff]  ;;  %vm107_vm0 = vcmask 1043456   ;;  %vm196_vm1 = vcmask 64512   ;;  %p647_p0 = scmp.ne.s32.totalorder %s861_s9, %s646_s0  ;;  %p650_p1 = scmp.lt.u32.totalorder %s646_s0, %s861_s9 }
   0xa   :  { %163 = vperm.xlu1 %635, %v113_v19   ;;  %v73_v29 = vmul.f32 %v746_v21, %v44_v17  ;;  %v75_v30 = vmul.f32 %v748_v22, %v45_v20  ;;  %v74_v32 = vmul.f32 %v69_v25, %v753_v24  ;;  %v115_v36 = vld [vmem:[%s857_s5 + $0x18] sm:$0xff]  ;;  %v88_v39 = vld [vmem:[%s853_s1 + $0x8] sm:$0xff]  ;;  %v404_v43 = vld [vmem:[%s860_s8] sm:$0xf]  ;;  %v91_v45 = vcombine.high %v87_v34, %v87_v34 }
   0xb   :  { %v76_v35 = vmul.f32 %v70_v27, %v755_v26  ;;  %v92_v48 = vcombine.high %v88_v39, %v88_v39  ;;  %v192_v55 = vld [vmem:[%s856_s4] sm:$0xff]  ;;  %v193_v57 = vld [vmem:[%s856_s4 + $0x8] sm:$0xff]  ;;  %v194_v58 = vld [vmem:[%s856_s4 + $0x10] sm:$0xff]  ;;  %vm410_vm2 = vcmask 261120   ;;  %p652_p2 = pnand %p650_p1, %p647_p0 }
   0xc   :  { %132 = vperm.xlu0 %634, %v118_v23   ;;  %v195_v59 = vld [vmem:[%s856_s4 + $0x18] sm:$0xff] }
   0xe   :  { %137 = vperm.xlu1 %635, %v119_v28  }
  0x10   :  { %v643_v33 = vpop.eup %642  ;;  %168 = vperm.xlu0 %634, %v114_v31  }
  0x11   :  { %v645_v37 = vpop.eup %644  ;;  %v79_v38 = vcombine.high %v643_v33, %v643_v33  ;;  %v83_v40 = vmul.f32 %v643_v33, %v73_v29 }
  0x12   :  { %v80_v41 = vcombine.high %v645_v37, %v645_v37  ;;  %v85_v42 = vmul.f32 %v645_v37, %v75_v30  ;;  %173 = vperm.xlu1 %635, %v115_v36  }
  0x13   :  { %v84_v44 = vmul.f32 %v79_v38, %v74_v32  ;;  %v99_v46 = vrot.slane %v83_v40, 4 }
  0x14   :  { %v86_v47 = vmul.f32 %v80_v41, %v76_v35  ;;  %v101_v49 = vrot.slane %v85_v42, 4  ;;  %407 = vperm.xlu0 %634, %v404_v43  }
  0x15   :  { %v100_v50 = vrot.slane %v84_v44, 4  ;;  %v108_v52 = vsel %vm107_vm0, %v87_v34, %v99_v46 }
  0x16   :  { %v102_v51 = vrot.slane %v86_v47, 4  ;;  %v110_v54 = vsel %vm107_vm0, %v88_v39, %v101_v49 }
  0x17   :  { %v109_v53 = vsel %vm107_vm0, %v91_v45, %v100_v50 }
  0x18   :  { %209 = vmatprep.subr.mxu0 %v109_v53  ;;  %v111_v56 = vsel %vm107_vm0, %v92_v48, %v102_v51 }
  0x19   :  { %298 = vmatprep.subr.mxu1 %v111_v56  ;;  %210 = vmatpush1.msra.mxu0 %v108_v52 }
  0x1a   :  { %299 = vmatpush1.msra.mxu1 %v110_v54  ;;  %603 = vmatmul.mubr.msk.f32.vlgmr.msra.gmra.mrb[0].mxu0 %vm196_vm1, %v192_v55 }
  0x1b   :  { %607 = vmatmul.mubr.msk.f32.vlgmr.msra.gmra.mrb[0].mxu1 %vm196_vm1, %v192_v55  ;;  %279 = vmatprep.mubr.f32.mxu0 %v658_v4 }
  0x1c   :  { %368 = vmatprep.mubr.f32.mxu1 %v658_v4 }
  0x1e   :  { %604 = vmatmul.mubr.msk.f32.gmra.mrb[2].mxu0 %vm196_vm1, %v193_v57 }
  0x1f   :  { %608 = vmatmul.mubr.msk.f32.gmra.mrb[2].mxu1 %vm196_vm1, %v193_v57  ;;  %285 = vmatprep.mubr.f32.mxu0 %v658_v4 }
  0x20   :  { %374 = vmatprep.mubr.f32.mxu1 %v658_v4 }
  0x22   :  { %605 = vmatmul.mubr.msk.f32.gmra.mrb[4].mxu0 %vm196_vm1, %v194_v58 }
  0x23   :  { %609 = vmatmul.mubr.msk.f32.gmra.mrb[4].mxu1 %vm196_vm1, %v194_v58  ;;  %291 = vmatprep.mubr.f32.mxu0 %v658_v4 }
  0x24   :  { %380 = vmatprep.mubr.f32.mxu1 %v658_v4 }
  0x26   :  { %606 = vmatmul.mubr.msk.f32.gmra.mrb[6].mxu0 %vm196_vm1, %v195_v59 }
  0x27   :  { %610 = vmatmul.mubr.msk.f32.gmra.mrb[6].mxu1 %vm196_vm1, %v195_v59  ;;  %478 = vmatprep.mubr.f32.mxu0 %v658_v4 }
  0x28   :  { %549 = vmatprep.mubr.f32.mxu1 %v658_v4 }
  0x82   :  { %v123_v60 = vpop.permute.xlu0 %122 }
  0x83   :  { %v140_v63 = vmul.f32 %v123_v60, %v746_v21  ;;  %v142_v2 = vmul.f32 %v123_v60, %v748_v22  ;;  %v141_v5 = vmul.f32 %v123_v60, %v753_v24  ;;  %v143_v6 = vmul.f32 %v123_v60, %v755_v26 }
  0x85   :  { %v159_v61 = vpop.permute.xlu1 %158 }
  0x86   :  { %v176_v9 = vadd.f32 %v159_v61, %v140_v63  ;;  %v178_v13 = vadd.f32 %v159_v61, %v142_v2  ;;  %v177_v14 = vadd.f32 %v159_v61, %v141_v5  ;;  %v179_v17 = vadd.f32 %v159_v61, %v143_v6 }
  0x87   :  { %v128_v62 = vpop.permute.xlu0 %127 }
  0x88   :  { %v144_v7 = vmul.f32 %v128_v62, %v746_v21  ;;  %v146_v8 = vmul.f32 %v128_v62, %v748_v22  ;;  %v145_v10 = vmul.f32 %v128_v62, %v753_v24  ;;  %v147_v4 = vmul.f32 %v128_v62, %v755_v26 }
  0x89   :  { %v164_v1 = vpop.permute.xlu1 %163 }
  0x8a   :  { %v180_v20 = vadd.f32 %v164_v1, %v144_v7  ;;  %v182_v23 = vadd.f32 %v164_v1, %v146_v8  ;;  %v181_v27 = vadd.f32 %v164_v1, %v145_v10  ;;  %v183_v28 = vadd.f32 %v164_v1, %v147_v4 }
  0x8b   :  { %v133_v11 = vpop.permute.xlu0 %132 }
  0x8c   :  { %v148_v29 = vmul.f32 %v133_v11, %v746_v21  ;;  %v150_v33 = vmul.f32 %v133_v11, %v748_v22  ;;  %v149_v34 = vmul.f32 %v133_v11, %v753_v24  ;;  %v151_v39 = vmul.f32 %v133_v11, %v755_v26 }
  0x8d   :  { %v138_v18 = vpop.permute.xlu1 %137 }
  0x8e   :  { %v152_v40 = vmul.f32 %v138_v18, %v746_v21  ;;  %v154_v44 = vmul.f32 %v138_v18, %v748_v22  ;;  %v153_v45 = vmul.f32 %v138_v18, %v753_v24  ;;  %v155_v50 = vmul.f32 %v138_v18, %v755_v26 }
  0x8f   :  { %v169_v46 = vpop.permute.xlu0 %168 }
  0x90   :  { %v184_v59 = vadd.f32 %v169_v46, %v148_v29  ;;  %v186_v62 = vadd.f32 %v169_v46, %v150_v33  ;;  %v185_v63 = vadd.f32 %v169_v46, %v149_v34  ;;  %v187_v26 = vadd.f32 %v169_v46, %v151_v39 }
  0x91   :  { %v174_v51 = vpop.permute.xlu1 %173  ;;  %v558_v39 = vcombine.high %v714_v0, %v714_v0 }
  0x92   :  { %v188_v6 = vadd.f32 %v174_v51, %v152_v40  ;;  %v190_v10 = vadd.f32 %v174_v51, %v154_v44  ;;  %v189_v4 = vadd.f32 %v174_v51, %v153_v45 }
  0xed   :  { %v275_v12 = vpop.f32.mrb[0].mxu0 }
  0xee   :  { %v364_v15 = vpop.f32.mrb[0].mxu1  ;;  %v277_v16 = vpop.f32.mrb[1].mxu0  ;;  %v276_v25 = vadd.f32 %v275_v12, %v176_v9 }
  0xef   :  { %v366_v19 = vpop.f32.mrb[1].mxu1  ;;  %v365_v30 = vadd.f32 %v364_v15, %v178_v13  ;;  %v278_v31 = vadd.f32 %v277_v16, %v177_v14  ;;  %v191_v15 = vadd.f32 %v174_v51, %v155_v50 }
  0xf0   :  { %v367_v35 = vadd.f32 %v366_v19, %v179_v17  ;;  %v387_v47 = vmax.f32 %v276_v25, 0.0 }
  0xf1   :  { %v281_v32 = vpop.f32.mrb[2].mxu0  ;;  %v389_v52 = vmax.f32 %v365_v30, 0.0  ;;  %v388_v53 = vmax.f32 %v278_v31, 0.0 }
  0xf2   :  { %v282_v36 = vadd.f32 %v281_v32, %v180_v20  ;;  %v370_v37 = vpop.f32.mrb[2].mxu1  ;;  %v283_v38 = vpop.f32.mrb[3].mxu0  ;;  %v390_v21 = vmax.f32 %v367_v35, 0.0 }
  0xf3   :  { %v371_v41 = vadd.f32 %v370_v37, %v182_v23  ;;  %v284_v42 = vadd.f32 %v283_v38, %v181_v27  ;;  %v372_v43 = vpop.f32.mrb[3].mxu1  ;;  %v408_v37 = vpop.permute.xlu0 %407 }
  0xf4   :  { %v391_v48 = vmax.f32 %v282_v36, 0.0  ;;  %v373_v49 = vadd.f32 %v372_v43, %v183_v28  ;;  %v403_v36 = vld [vmem:[%s859_s7] sm:$0xf]  ;;  %v559_v43 = vcombine.high %v720_v3, %v720_v3 }
  0xf5   :  { %v393_v54 = vmax.f32 %v371_v41, 0.0  ;;  %v392_v55 = vmax.f32 %v284_v42, 0.0  ;;  %v287_v56 = vpop.f32.mrb[4].mxu0 }
  0xf6   :  { %v615_v57 = vpack.c.bf16 %v391_v48, %v387_v47  ;;  %v394_v58 = vmax.f32 %v373_v49, 0.0  ;;  %v376_v60 = vpop.f32.mrb[4].mxu1  ;;  %v289_v22 = vpop.f32.mrb[5].mxu0  ;;  %v288_v5 = vadd.f32 %v287_v56, %v184_v59 }
  0xf7   :  { %v623_v61 = vpack.c.bf16 %v393_v54, %v389_v52  ;;  %v613_v24 = vpack.c.bf16 %v392_v55, %v388_v53  ;;  %v378_v1 = vpop.f32.mrb[5].mxu1  ;;  %v377_v7 = vadd.f32 %v376_v60, %v186_v62  ;;  %v290_v8 = vadd.f32 %v289_v22, %v185_v63 }
  0xf8   :  { %v621_v2 = vpack.c.bf16 %v394_v58, %v390_v21  ;;  %v379_v11 = vadd.f32 %v378_v1, %v187_v26  ;;  %v395_v19 = vmax.f32 %v288_v5, 0.0 }
  0xf9   :  { %v293_v9 = vpop.f32.mrb[6].mxu0  ;;  %614 = vmatprep.subr.bf16.mxu0 %v613_v24  ;;  %v397_v25 = vmax.f32 %v377_v7, 0.0  ;;  %v396_v27 = vmax.f32 %v290_v8, 0.0 }
  0xfa   :  { %v294_v12 = vadd.f32 %v293_v9, %v188_v6  ;;  %v382_v13 = vpop.f32.mrb[6].mxu1  ;;  %622 = vmatprep.subr.bf16.mxu1 %v621_v2  ;;  %v295_v14 = vpop.f32.mrb[7].mxu0  ;;  %616 = vmatpush1.bf16.msra.mxu0 %v615_v57  ;;  %v398_v30 = vmax.f32 %v379_v11, 0.0 }
  0xfb   :  { %v383_v16 = vadd.f32 %v382_v13, %v190_v10  ;;  %v296_v17 = vadd.f32 %v295_v14, %v189_v4  ;;  %v384_v18 = vpop.f32.mrb[7].mxu1  ;;  %624 = vmatpush1.bf16.msra.mxu1 %v623_v61 }
  0xfc   :  { %v399_v20 = vmax.f32 %v294_v12, 0.0  ;;  %v385_v23 = vadd.f32 %v384_v18, %v191_v15 }
  0xfd   :  { %v401_v28 = vmax.f32 %v383_v16, 0.0  ;;  %v400_v29 = vmax.f32 %v296_v17, 0.0 }
  0xfe   :  { %v619_v31 = vpack.c.bf16 %v399_v20, %v395_v19  ;;  %v402_v32 = vmax.f32 %v385_v23, 0.0 }
  0xff   :  { %v627_v33 = vpack.c.bf16 %v401_v28, %v397_v25  ;;  %v617_v34 = vpack.c.bf16 %v400_v29, %v396_v27 }
 0x100   :  { %v625_v35 = vpack.c.bf16 %v402_v32, %v398_v30 }
 0x101   :  { %618 = vmatprep.subr.bf16.mxu0 %v617_v34 }
 0x102   :  { %626 = vmatprep.subr.bf16.mxu1 %v625_v35  ;;  %620 = vmatpush1.bf16.msra.mxu0 %v619_v31 }
 0x103   :  { %628 = vmatpush1.bf16.msra.mxu1 %v627_v33 }
 0x105   :  { %611 = vmatmul.mubr.msk.f32.vlgmr.msra.gmra.mrb[8].mxu0 %vm410_vm2, %v403_v36 }
 0x106   :  { %612 = vmatmul.mubr.msk.f32.vlgmr.msra.gmra.mrb[8].mxu1 %vm410_vm2, %v403_v36 }
 0x1d8   :  { %v480_v38 = vpop.f32.mrb[8].mxu0 }
 0x1d9   :  { %v481_v40 = vadd.f32 %v480_v38, %v408_v37  ;;  %v551_v41 = vpop.f32.mrb[8].mxu1  ;;  %v482_v42 = vpop.f32.mrb[9].mxu0 }
 0x1da   :  { %v552_v44 = vadd.f32 %v551_v41, %v408_v37  ;;  %v483_v45 = vadd.f32 %v482_v42, %v408_v37  ;;  %v553_v46 = vpop.f32.mrb[9].mxu1 }
 0x1db   :  { %v562_v47 = vsub.f32 %v481_v40, %v714_v0  ;;  %v554_v48 = vadd.f32 %v553_v46, %v408_v37 }
 0x1dc   :  { %v564_v49 = vsub.f32 %v552_v44, %v720_v3  ;;  %v563_v50 = vsub.f32 %v483_v45, %v558_v39 }
 0x1dd   :  { %v566_v51 = vand.u32 2147483647, %v562_v47  ;;  %v565_v52 = vsub.f32 %v554_v48, %v559_v43 }
 0x1de   :  { %v568_v53 = vand.u32 2147483647, %v564_v49  ;;  %v567_v54 = vand.u32 2147483647, %v563_v50 }
 0x1df   :  { %v570_v55 = vsel %vm107_vm0, %v566_v51, 0.0  ;;  %v569_v21 = vand.u32 2147483647, %v565_v52 }
 0x1e0   :  { %v571_v56 = vsel %vm107_vm0, %v567_v54, 0.0  ;;  %v573_v58 = vsel %vm107_vm0, %v568_v53, 0.0 }
 0x1e1   :  { %v572_v57 = vadd.f32 %v571_v56, %v570_v55  ;;  %v575_v60 = vsel %vm107_vm0, %v569_v21, 0.0 }
 0x1e3   :  { %v574_v59 = vadd.f32 %v573_v58, %v572_v57 }
 0x1e5   :  { %v576_v0 = vadd.f32 %v575_v60, %v574_v59 }
 0x1e7   :  { %577 = vadd.xlane.f32.xlu1 %v576_v0 }
 0x274   :  { %v578_v22 = vpop.xlane.xlu1 %577 }
 0x275   :  { %v579_v3 = vrot.slane %v578_v22, 4 }
 0x277   :  { %v580_v61 = vadd.f32 %v579_v3, %v578_v22 }
 0x279   :  { %v581_v24 = vrot.slane %v580_v61, 2 }
 0x27b   :  { %v582_v62 = vadd.f32 %v581_v24, %v580_v61 }
 0x27d   :  { %v583_v63 = vrot.slane %v582_v62, 1 }
 0x27f   :  { %v584_v1 = vadd.f32 %v583_v63, %v582_v62 }
 0x281   :  { %629 = vpush %v584_v1 }
 0x2b2   :  { %s630_s7 = spop %629 }
 0x2b3   :  { %587 = sst [smem:[#allocation2]] %s630_s7 }
 0x2b4   :  { %655 = shalt.err (!%p652_p2)
}
 0x2b5   :  { %s660_s27 = smov [#allocation2]  }
 0x2b6   :  { %595 = dma.smem_to_hbm %s660_s27, 16, %s861_s9, [#allocation3]  }
 0x2b7   :  { %656 = dma.done.wait [#allocation3], 16  }
 0x2b8   :  { %657 = vsyncadd [#allocation3], 4294967280 }
 0x2b9   :  { %599 = sfence }
 0x2ba   :  { %600 = vsyncpa [#allocation3], 1 }

</bundles_post_ra>
